<compile_context>
chip_gen: v6e
topology: v6e:2x2x1
jax: 0.10.0
libtpu: 0.0.40
codegen_flags: <defaults>
</compile_context>

<pallas_src>
import functools

import jax
import jax.numpy as jnp
from jax.experimental import pallas as pl
from jax.experimental.pallas import tpu as pltpu


def _round_up(x, m):
    return (x + m - 1) // m * m


def _derive_tiling(inter, H, tm, e_pad):
    """Pick intermediate tile size, weight pipeline depth and VMEM limit from
    the actual per-generation VMEM capacity (v5e/v6e 128 MiB, v7x 64 MiB)."""
    try:
        cap = int(pltpu.get_tpu_info().vmem_capacity_bytes)
    except Exception:  # interpret mode / older runtimes
        cap = 64 * 1024 * 1024
    budget = int(cap * 0.80)

    def usage(ti, wbuf):
        return (2 * tm * H * 2             # x tile (bf16), double buffered
                + 3 * wbuf * ti * H * 2    # gate / up / down weight tiles
                + 2 * tm * e_pad * 4       # routing-weight block (f32)
                + 2 * tm * H * 2           # bf16 output block
                + tm * H * 4 + 4 * 128     # f32 accumulator + w_col scratch
                + (1 << 20))               # internal scratch slack

    cands = [d for d in range(inter, 0, -1)
             if inter % d == 0 and (d % 128 == 0 or d == inter)]
    ti, wbuf = cands[-1], 2
    for d in cands:
        nb = 3 if (cap >= 100 * 1024 * 1024 and d * H * 2 >= (2 << 20)) else 2
        if usage(d, nb) <= budget:
            ti, wbuf = d, nb
            break
    vmem_limit = int(min(cap * 0.85,
                         max(32 * 1024 * 1024, 1.25 * usage(ti, wbuf))))
    return ti, wbuf, vmem_limit


# ---------------------------------------------------------------------------
# Pallas kernels
# ---------------------------------------------------------------------------
def _gate_kernel(x_ref, wg_ref, o_ref):
    # router_logits = x @ wg.T   ([tm,H] x [E_pad,H] -> [tm,E_pad], lane-dense)
    o_ref[...] = jax.lax.dot_general(
        x_ref[...], wg_ref[...],
        dimension_numbers=(((1,), (1,)), ((), ())),
        preferred_element_type=jnp.float32,
    )


def _moe_kernel(ids_ref, flags_ref, x_ref, w1g_ref, w1u_ref, w2_ref, tw_ref,
                o_ref, acc_ref, wcol_ref):
    """grid = (token_tile, active_slot, inner_tile)."""
    t = pl.program_id(0)
    s = pl.program_id(1)
    k = pl.program_id(2)
    ns = pl.num_programs(1)
    nk = pl.num_programs(2)

    @pl.when(jnp.logical_and(s == 0, k == 0))
    def _():
        acc_ref[...] = jnp.zeros_like(acc_ref)

    flag = flags_ref[t * ns + s]

    # Per-token routing weight for this slot: selected once per slot (k == 0)
    # from the resident lane-dense [tm, E_pad] block into a [tm,1] scratch.
    @pl.when(jnp.logical_and(flag != 0, k == 0))
    def _():
        slot = ids_ref[t * ns + s]
        lanes = jax.lax.broadcasted_iota(jnp.int32, tw_ref.shape, 1)
        wcol_ref[...] = jnp.sum(jnp.where(lanes == slot, tw_ref[...], 0.0),
                                axis=1, keepdims=True)

    # Padded / inactive slots skip all MXU work; their index_maps repeat the
    # previous block index so the weight DMA is also skipped (dedup).
    @pl.when(flag != 0)
    def _():
        dn = (((1,), (1,)), ((), ()))
        x = x_ref[...]                                               # [tm,H]
        g = jax.lax.dot_general(x, w1g_ref[...], dn,
                                preferred_element_type=jnp.float32)  # [tm,ti]
        u = jax.lax.dot_general(x, w1u_ref[...], dn,
                                preferred_element_type=jnp.float32)  # [tm,ti]
        # SiluAndMul, scaled by the routing weight on the narrow activation.
        act = (wcol_ref[...] * (g * jax.nn.sigmoid(g) * u)).astype(x.dtype)
        acc_ref[...] += jnp.dot(act, w2_ref[...],
                                preferred_element_type=jnp.float32)  # [tm,H]

    @pl.when(jnp.logical_and(s == ns - 1, k == nk - 1))
    def _():
        o_ref[...] = acc_ref[...].astype(o_ref.dtype)


# ---------------------------------------------------------------------------
# Wrappers
# ---------------------------------------------------------------------------
def router_logits(x_bf16, gate_w, tm):
    """x_bf16: [T_pad, H] bf16, gate_w: [E, H] -> [T_pad, E] f32."""
    T_pad, H = x_bf16.shape
    E = gate_w.shape[0]
    E_pad = _round_up(E, 128)           # lane-dense output (no masked vst)
    gw = jnp.zeros((E_pad, H), jnp.bfloat16).at[:E].set(
        gate_w.astype(jnp.bfloat16))
    out = pl.pallas_call(
        _gate_kernel,
        out_shape=jax.ShapeDtypeStruct((T_pad, E_pad), jnp.float32),
        grid_spec=pltpu.PrefetchScalarGridSpec(
            num_scalar_prefetch=0,
            grid=(T_pad // tm,),
            in_specs=[pl.BlockSpec((tm, H), lambda t: (t, 0)),
                      pl.BlockSpec((E_pad, H), lambda t: (0, 0))],
            out_specs=pl.BlockSpec((tm, E_pad), lambda t: (t, 0))),
        compiler_params=pltpu.CompilerParams(
            dimension_semantics=("parallel",)),
        cost_estimate=pl.CostEstimate(
            flops=2 * T_pad * E_pad * H,
            transcendentals=0,
            bytes_accessed=(T_pad * H + E_pad * H) * 2 + T_pad * E_pad * 4),
    )(x_bf16, gw)
    return out[:, :E]


def moe_experts(x_bf16, w1g_all, w1u_all, w2t_all, dense_full, ids_flat,
                flags_flat, *, tm, ti, s_max, wbuf, vmem_limit):
    """out[t] = sum_s dense[t, slot(t,s)] * MLP_slot(x[t])   (bf16 MXU)."""
    T_pad, H = x_bf16.shape
    e_total, inter, _ = w1g_all.shape
    e_pad = dense_full.shape[1]
    nt = T_pad // tm
    nk = inter // ti

    # Dedup index map: padded slots reuse the previously fetched weight block
    # (same block index -> the pipeline skips the DMA).
    def w_map(t, s, k, ids, flags):
        idx = t * s_max + s
        f = flags[idx]
        k_idx = k * f + (nk - 1) * (1 - f)
        return (ids[idx], k_idx, 0)

    wkw = dict(pipeline_mode=pl.Buffered(wbuf)) if wbuf > 2 else {}

    cost = pl.CostEstimate(
        flops=6 * T_pad * inter * H * s_max,
        transcendentals=T_pad * inter * s_max,
        bytes_accessed=int(nt * s_max * 3 * inter * H * 2
                           + x_bf16.size * 2 + dense_full.size * 4
                           + T_pad * H * 2))

    return pl.pallas_call(
        _moe_kernel,
        out_shape=jax.ShapeDtypeStruct((T_pad, H), jnp.bfloat16),
        grid_spec=pltpu.PrefetchScalarGridSpec(
            num_scalar_prefetch=2,
            grid=(nt, s_max, nk),
            in_specs=[
                pl.BlockSpec((tm, H), lambda t, s, k, ids, flags: (t, 0)),
                pl.BlockSpec((None, ti, H), w_map, **wkw),
                pl.BlockSpec((None, ti, H), w_map, **wkw),
                pl.BlockSpec((None, ti, H), w_map, **wkw),
                pl.BlockSpec((tm, e_pad), lambda t, s, k, ids, flags: (t, 0)),
            ],
            out_specs=pl.BlockSpec((tm, H),
                                   lambda t, s, k, ids, flags: (t, 0)),
            scratch_shapes=[pltpu.VMEM((tm, H), jnp.float32),
                            pltpu.VMEM((tm, 1), jnp.float32)]),
        compiler_params=pltpu.CompilerParams(
            dimension_semantics=("parallel", "arbitrary", "arbitrary"),
            vmem_limit_bytes=vmem_limit),
        cost_estimate=cost,
    )(ids_flat, flags_flat, x_bf16, w1g_all, w1u_all, w2t_all, dense_full)


def deepseek_moe_forward(hidden_states, params, *, top_k, norm_topk_prob):
    """Pallas implementation of DeepseekMoE.forward (tp_size == 1)."""
    x = hidden_states
    T, H = x.shape
    w1, w2 = params["w1"], params["w2"]
    E, two_i, _ = w1.shape
    inter = two_i // 2

    sw1 = params.get("shared_w1")
    sw2 = params.get("shared_w2")
    n_shared = 0
    if sw1 is not None:
        i_s = sw1.shape[0] // 2
        n_shared = i_s // inter

    # ---- token tiling ------------------------------------------------------
    # tm <= 128 keeps the per-tile union of active experts sparse.
    # TODO(synk): grouped-GEMM restructure (sort tokens by expert, prefetch
    # group row offsets into the x index_map) for exact top_k/E compute ratio.
    tm = min(128, _round_up(T, 8))
    T_pad = _round_up(T, tm)
    nt = T_pad // tm

    x_bf16 = jnp.zeros((T_pad, H), jnp.bfloat16).at[:T].set(
        x.astype(jnp.bfloat16))

    # ---- router gate (Pallas, bf16 MXU) + routing glue (XLA) ---------------
    # TODO(synk): softmax/top_k/scatter routing glue has no clean Pallas
    # equivalent and stays in XLA; all matmuls are Pallas kernels.
    logits = router_logits(x_bf16, params["gate_w"], tm)[:T]
    probs = jax.nn.softmax(logits, axis=-1)
    topk_w, topk_idx = jax.lax.top_k(probs, top_k)
    if norm_topk_prob:
        topk_w = topk_w / jnp.sum(topk_w, axis=-1, keepdims=True)
    dense = jnp.zeros((T, E), jnp.float32).at[
        jnp.arange(T)[:, None], topk_idx].add(topk_w)                 # [T, E]

    # ---- pack weights: shared experts -> n_shared virtual experts ----------
    # Down-proj pre-transposed to [e, inter, H] (canonical [K, N] MXU feed).
    w1g = w1[:, :inter, :]
    w1u = w1[:, inter:, :]
    w2t = jnp.transpose(w2, (0, 2, 1))
    if n_shared > 0:
        sg = sw1[:i_s].reshape(n_shared, inter, H)
        su = sw1[i_s:].reshape(n_shared, inter, H)
        sd = jnp.transpose(sw2, (1, 0)).reshape(n_shared, inter, H)
        w1g_all = jnp.concatenate([sg, w1g], axis=0)
        w1u_all = jnp.concatenate([su, w1u], axis=0)
        w2t_all = jnp.concatenate([sd, w2t], axis=0)
    else:
        w1g_all, w1u_all, w2t_all = w1g, w1u, w2t

    # bf16 weights / activations, f32 accumulation on the MXU.
    # TODO(synk): int8 (v5e/v6e) / fp8 (v7x) weight quantization with
    # per-channel scales folded into w_col (halves weight HBM traffic).
    w1g_all = w1g_all.astype(jnp.bfloat16)
    w1u_all = w1u_all.astype(jnp.bfloat16)
    w2t_all = w2t_all.astype(jnp.bfloat16)

    e_total = E + n_shared
    e_pad = _round_up(e_total, 128)
    dense_full = jnp.zeros((T_pad, e_pad), jnp.float32)
    if n_shared > 0:
        dense_full = dense_full.at[:T, :n_shared].set(1.0)
    dense_full = dense_full.at[:T, n_shared:n_shared + E].set(dense)

    # ---- compress the expert axis to at most s_max active slots per tile ---
    s_max = int(min(e_total, tm * top_k + n_shared))
    blocks = dense_full[:, :e_total].reshape(nt, tm, e_total)
    tile_active = jnp.any(blocks != 0.0, axis=1)                      # [nt,Et]
    key = jnp.where(tile_active,
                    jnp.arange(e_total, dtype=jnp.int32)[None, :],
                    jnp.int32(e_total))
    order = jnp.sort(key, axis=1)[:, :s_max]                          # [nt,S]
    flags = (order < e_total).astype(jnp.int32)
    valid = jnp.where(flags == 1, order, -1)
    ids = jnp.maximum(jax.lax.cummax(valid, axis=1), 0).astype(jnp.int32)

    ti, wbuf, vmem_limit = _derive_tiling(inter, H, tm, e_pad)

    out = moe_experts(x_bf16, w1g_all, w1u_all, w2t_all, dense_full,
                      ids.reshape(-1), flags.reshape(-1),
                      tm=tm, ti=ti, s_max=s_max, wbuf=wbuf,
                      vmem_limit=vmem_limit)

    # tensor_model_parallel_all_reduce: no-op for tp_size == 1
    # TODO(synk): v7x decode (nt==1): split the slot list across the 2 TCs.
    return out[:T].astype(hidden_states.dtype)


# ---------------------------------------------------------------------------
# Pure-JAX reference (same bf16 weights / f32 accumulation)
# ---------------------------------------------------------------------------
def _mlp_ref(x, w1g, w1u, w2):
    dn = (((1,), (1,)), ((), ()))
    xb = x.astype(jnp.bfloat16)
    g = jax.lax.dot_general(xb, w1g.astype(jnp.bfloat16), dn,
                            preferred_element_type=jnp.float32)
    u = jax.lax.dot_general(xb, w1u.astype(jnp.bfloat16), dn,
                            preferred_element_type=jnp.float32)
    act = (g * jax.nn.sigmoid(g) * u).astype(jnp.bfloat16)
    return jax.lax.dot_general(act, w2.astype(jnp.bfloat16), dn,
                               preferred_element_type=jnp.float32)


def _ref_forward(x, params, *, top_k, norm_topk_prob):
    T, H = x.shape
    w1, w2 = params["w1"], params["w2"]
    E, two_i, _ = w1.shape
    inter = two_i // 2
    sw1, sw2 = params["shared_w1"], params["shared_w2"]
    i_s = sw1.shape[0] // 2
    shared = _mlp_ref(x, sw1[:i_s], sw1[i_s:], sw2)
    dn = (((1,), (1,)), ((), ()))
    logits = jax.lax.dot_general(x.astype(jnp.bfloat16),
                                 params["gate_w"].astype(jnp.bfloat16), dn,
                                 preferred_element_type=jnp.float32)
    probs = jax.nn.softmax(logits, axis=-1)
    tw, tidx = jax.lax.top_k(probs, top_k)
    if norm_topk_prob:
        tw = tw / jnp.sum(tw, axis=-1, keepdims=True)
    dense = jnp.zeros((T, E), jnp.float32).at[
        jnp.arange(T)[:, None], tidx].add(tw)
    out = shared
    for e in range(E):
        out = out + dense[:, e:e + 1] * _mlp_ref(x, w1[e, :inter],
                                                 w1[e, inter:], w2[e])
    return out


# ---------------------------------------------------------------------------
# Main
# ---------------------------------------------------------------------------
if __name__ == "__main__":
    # small DeepseekMoE config
    hidden_size = 64
    moe_intermediate_size = 32
    n_routed_experts = 8
    num_experts_per_tok = 2
    n_shared_experts = 2
    norm_topk_prob = True
    num_tokens = 8

    shared_inter = moe_intermediate_size * n_shared_experts

    key = jax.random.PRNGKey(0)
    k_x, k_w1, k_w2, k_sw1, k_sw2, k_g = jax.random.split(key, 6)

    scale = 0.05
    params = {
        "w1": scale * jax.random.normal(
            k_w1, (n_routed_experts, 2 * moe_intermediate_size, hidden_size),
            jnp.float32),
        "w2": scale * jax.random.normal(
            k_w2, (n_routed_experts, hidden_size, moe_intermediate_size),
            jnp.float32),
        "shared_w1": scale * jax.random.normal(
            k_sw1, (2 * shared_inter, hidden_size), jnp.float32),
        "shared_w2": scale * jax.random.normal(
            k_sw2, (hidden_size, shared_inter), jnp.float32),
        "gate_w": scale * jax.random.normal(
            k_g, (n_routed_experts, hidden_size), jnp.float32),
    }

    x = jax.random.normal(k_x, (num_tokens, hidden_size), jnp.float32)

    fwd = jax.jit(functools.partial(deepseek_moe_forward,
                                    top_k=num_experts_per_tok,
                                    norm_topk_prob=norm_topk_prob))
    out = jax.block_until_ready(fwd(x, params))

    ref = _ref_forward(x, params, top_k=num_experts_per_tok,
                       norm_topk_prob=norm_topk_prob)
    assert out.shape == (num_tokens, hidden_size)
    assert jnp.allclose(out, ref, rtol=2e-2, atol=2e-2), (
        float(jnp.max(jnp.abs(out - ref))))

    print("KERNEL_OK")
</pallas_src>

<mosaic_0001>
module attributes {stable_mosaic.version = 11 : i64} {
  func.func private @main(%arg0: i32) attributes {dimension_semantics = [#tpu.dimension_semantics<core_parallel>], iteration_bounds = array<i64: 2>, tpu.core_type = #tpu.core_type<sc_scalar_subcore>, window_params = []} {
    return
  }
}

module attributes {stable_mosaic.version = 11 : i64} {
  func.func private @main(%arg0: i32) attributes {dimension_semantics = [#tpu.dimension_semantics<core_parallel>], iteration_bounds = array<i64: 2>, tpu.core_type = #tpu.core_type<sc_scalar_subcore>, window_params = []} {
    return
  }
}

module attributes {stable_mosaic.version = 11 : i64} {
  func.func @_gate_kernel(%arg0: i32, %arg1: memref<8x64xbf16, #tpu.memory_space<vmem>>, %arg2: memref<128x64xbf16, #tpu.memory_space<vmem>>, %arg3: memref<8x128xf32, #tpu.memory_space<vmem>>) attributes {dimension_semantics = [#tpu.dimension_semantics<parallel>], iteration_bounds = array<i64: 1>, scalar_prefetch = 0 : i64, scratch_operands = 0 : i64, tpu.core_type = #tpu.core_type<tc>, window_params = [{transform_indices = @transform_0, window_bounds = array<i64: 8, 64>}, {pipeline_mode = #tpu.pipeline_mode<synchronous>, transform_indices = @transform_1, window_bounds = array<i64: 128, 64>}, {transform_indices = @transform_2, window_bounds = array<i64: 8, 128>}]} {
    %c0 = arith.constant 0 : index
    %c0_0 = arith.constant 0 : index
    %0 = vector.load %arg1[%c0, %c0_0] : memref<8x64xbf16, #tpu.memory_space<vmem>>, vector<8x64xbf16>
    %c0_1 = arith.constant 0 : index
    %c0_2 = arith.constant 0 : index
    %1 = vector.load %arg2[%c0_1, %c0_2] : memref<128x64xbf16, #tpu.memory_space<vmem>>, vector<128x64xbf16>
    %cst = arith.constant dense<0.000000e+00> : vector<8x128xf32>
    %2 = tpu.matmul %0, %1, %cst {dimension_numbers = #tpu.dot_dimension_numbers<[1], [1], [0], [0], [0, 0, 1, 0], [], []>} : vector<8x64xbf16>, vector<128x64xbf16>, vector<8x128xf32> -> vector<8x128xf32>
    %c0_3 = arith.constant 0 : index
    %c0_4 = arith.constant 0 : index
    %3 = vector.load %arg3[%c0_3, %c0_4] : memref<8x128xf32, #tpu.memory_space<vmem>>, vector<8x128xf32>
    tpu.vector_store %arg3[%c0_3, %c0_4], %2 {strides = array<i32>} : memref<8x128xf32, #tpu.memory_space<vmem>>, vector<8x128xf32>,
    return
  }
  func.func @transform_0(%arg0: i32) -> (i32, i32) {
    %c0_i32 = arith.constant 0 : i32
    %c0_i32_0 = arith.constant 0 : i32
    return %arg0, %c0_i32 : i32, i32
  }
  func.func @transform_1(%arg0: i32) -> (i32, i32) {
    %c0_i32 = arith.constant 0 : i32
    %c0_i32_0 = arith.constant 0 : i32
    %c0_i32_1 = arith.constant 0 : i32
    return %c0_i32, %c0_i32_0 : i32, i32
  }
  func.func @transform_2(%arg0: i32) -> (i32, i32) {
    %c0_i32 = arith.constant 0 : i32
    %c0_i32_0 = arith.constant 0 : i32
    return %arg0, %c0_i32 : i32, i32
  }
}

module attributes {stable_mosaic.version = 11 : i64} {
  func.func @_moe_kernel(%arg0: i32, %arg1: i32, %arg2: i32, %arg3: memref<10xi32, #tpu.memory_space<smem>>, %arg4: memref<10xi32, #tpu.memory_space<smem>>, %arg5: memref<8x64xbf16, #tpu.memory_space<vmem>>, %arg6: memref<1x32x64xbf16, #tpu.memory_space<vmem>>, %arg7: memref<1x32x64xbf16, #tpu.memory_space<vmem>>, %arg8: memref<1x32x64xbf16, #tpu.memory_space<vmem>>, %arg9: memref<8x128xf32, #tpu.memory_space<vmem>>, %arg10: memref<8x64xbf16, #tpu.memory_space<vmem>>, %arg11: memref<8x64xf32, #tpu.memory_space<vmem>>, %arg12: memref<8x1xf32, #tpu.memory_space<vmem>>) attributes {dimension_semantics = [#tpu.dimension_semantics<parallel>, #tpu.dimension_semantics<arbitrary>, #tpu.dimension_semantics<arbitrary>], iteration_bounds = array<i64: 1, 10, 1>, scalar_prefetch = 2 : i64, scratch_operands = 2 : i64, tpu.core_type = #tpu.core_type<tc>, window_params = [{transform_indices = @transform_0, window_bounds = array<i64: 8, 64>}, {transform_indices = @transform_1, window_bounds = array<i64: 1, 32, 64>}, {transform_indices = @transform_2, window_bounds = array<i64: 1, 32, 64>}, {transform_indices = @transform_3, window_bounds = array<i64: 1, 32, 64>}, {transform_indices = @transform_4, window_bounds = array<i64: 8, 128>}, {transform_indices = @transform_5, window_bounds = array<i64: 8, 64>}]} {
    %c0_i32 = arith.constant 0 : i32
    %0 = arith.cmpi eq, %arg1, %c0_i32 : i32
    %c0_i32_0 = arith.constant 0 : i32
    %1 = arith.cmpi eq, %arg2, %c0_i32_0 : i32
    %2 = arith.andi %0, %1 : i1
    %3 = arith.extui %2 : i1 to i32
    %c0_i32_1 = arith.constant 0 : i32
    %4 = arith.cmpi ne, %3, %c0_i32_1 : i32
    scf.if %4 {
      %cst = arith.constant 0.000000e+00 : f32
      %22 = vector.broadcast %cst : f32 to vector<8x64xf32>
      %c0 = arith.constant 0 : index
      %c0_9 = arith.constant 0 : index
      %23 = vector.load %arg11[%c0, %c0_9] : memref<8x64xf32, #tpu.memory_space<vmem>>, vector<8x64xf32>
      tpu.vector_store %arg11[%c0, %c0_9], %22 {strides = array<i32>} : memref<8x64xf32, #tpu.memory_space<vmem>>, vector<8x64xf32>,
    } else {
    }
    %c10_i32 = arith.constant 10 : i32
    %5 = arith.muli %arg0, %c10_i32 : i32
    %6 = arith.addi %5, %arg1 : i32
    %7 = arith.index_cast %6 : i32 to index
    %8 = memref.load %arg4[%7] : memref<10xi32, #tpu.memory_space<smem>>
    %c0_i32_2 = arith.constant 0 : i32
    %9 = arith.cmpi ne, %8, %c0_i32_2 : i32
    %c0_i32_3 = arith.constant 0 : i32
    %10 = arith.cmpi eq, %arg2, %c0_i32_3 : i32
    %11 = arith.andi %9, %10 : i1
    %12 = arith.extui %11 : i1 to i32
    %c0_i32_4 = arith.constant 0 : i32
    %13 = arith.cmpi ne, %12, %c0_i32_4 : i32
    scf.if %13 {
      %c10_i32_9 = arith.constant 10 : i32
      %22 = arith.muli %arg0, %c10_i32_9 : i32
      %23 = arith.addi %22, %arg1 : i32
      %24 = arith.index_cast %23 : i32 to index
      %25 = memref.load %arg3[%24] : memref<10xi32, #tpu.memory_space<smem>>
      %26 = tpu.iota {dimensions = array<i32: 1>} : vector<8x128xi32>
      %27 = vector.broadcast %25 : i32 to vector<8x128xi32>
      %28 = arith.cmpi eq, %26, %27 : vector<8x128xi32>
      %c0 = arith.constant 0 : index
      %c0_10 = arith.constant 0 : index
      %29 = vector.load %arg9[%c0, %c0_10] : memref<8x128xf32, #tpu.memory_space<vmem>>, vector<8x128xf32>
      %cst = arith.constant 0.000000e+00 : f32
      %30 = vector.broadcast %cst : f32 to vector<8x128xf32>
      %31 = arith.select %28, %29, %30 : vector<8x128xi1>, vector<8x128xf32>
      %cst_11 = arith.constant dense<0.000000e+00> : vector<8xf32>
      %32 = vector.multi_reduction <add>, %31, %cst_11 [1] : vector<8x128xf32> to vector<8xf32>
      %33 = vector.shape_cast %32 : vector<8xf32> to vector<8x1xf32>
      %c0_12 = arith.constant 0 : index
      %c0_13 = arith.constant 0 : index
      %34 = vector.load %arg12[%c0_12, %c0_13] : memref<8x1xf32, #tpu.memory_space<vmem>>, vector<8x1xf32>
      tpu.vector_store %arg12[%c0_12, %c0_13], %33 {strides = array<i32>} : memref<8x1xf32, #tpu.memory_space<vmem>>, vector<8x1xf32>,
    } else {
    }
    %c0_i32_5 = arith.constant 0 : i32
    %14 = arith.cmpi ne, %8, %c0_i32_5 : i32
    %15 = arith.extui %14 : i1 to i32
    %c0_i32_6 = arith.constant 0 : i32
    %16 = arith.cmpi ne, %15, %c0_i32_6 : i32
    scf.if %16 {
      %c0 = arith.constant 0 : index
      %c0_9 = arith.constant 0 : index
      %22 = vector.load %arg5[%c0, %c0_9] : memref<8x64xbf16, #tpu.memory_space<vmem>>, vector<8x64xbf16>
      %c0_10 = arith.constant 0 : index
      %c0_11 = arith.constant 0 : index
      %c0_12 = arith.constant 0 : index
      %23 = vector.load %arg6[%c0_10, %c0_11, %c0_12] : memref<1x32x64xbf16, #tpu.memory_space<vmem>>, vector<1x32x64xbf16>
      %24 = vector.shape_cast %23 : vector<1x32x64xbf16> to vector<32x64xbf16>
      %cst = arith.constant dense<0.000000e+00> : vector<8x32xf32>
      %25 = tpu.matmul %22, %24, %cst {dimension_numbers = #tpu.dot_dimension_numbers<[1], [1], [0], [0], [0, 0, 1, 0], [], []>} : vector<8x64xbf16>, vector<32x64xbf16>, vector<8x32xf32> -> vector<8x32xf32>
      %c0_13 = arith.constant 0 : index
      %c0_14 = arith.constant 0 : index
      %c0_15 = arith.constant 0 : index
      %26 = vector.load %arg7[%c0_13, %c0_14, %c0_15] : memref<1x32x64xbf16, #tpu.memory_space<vmem>>, vector<1x32x64xbf16>
      %27 = vector.shape_cast %26 : vector<1x32x64xbf16> to vector<32x64xbf16>
      %cst_16 = arith.constant dense<0.000000e+00> : vector<8x32xf32>
      %28 = tpu.matmul %22, %27, %cst_16 {dimension_numbers = #tpu.dot_dimension_numbers<[1], [1], [0], [0], [0, 0, 1, 0], [], []>} : vector<8x64xbf16>, vector<32x64xbf16>, vector<8x32xf32> -> vector<8x32xf32>
      %c0_17 = arith.constant 0 : index
      %c0_18 = arith.constant 0 : index
      %29 = vector.load %arg12[%c0_17, %c0_18] : memref<8x1xf32, #tpu.memory_space<vmem>>, vector<8x1xf32>
      %30 = arith.negf %25 : vector<8x32xf32>
      %31 = math.exp %30 : vector<8x32xf32>
      %cst_19 = arith.constant 1.000000e+00 : f32
      %32 = vector.broadcast %cst_19 : f32 to vector<8x32xf32>
      %33 = arith.addf %32, %31 : vector<8x32xf32>
      %34 = arith.divf %32, %33 : vector<8x32xf32>
      %35 = arith.mulf %25, %34 : vector<8x32xf32>
      %36 = arith.mulf %35, %28 : vector<8x32xf32>
      %37 = vector.broadcast %29 : vector<8x1xf32> to vector<8x32xf32>
      %38 = arith.mulf %37, %36 : vector<8x32xf32>
      %39 = arith.truncf %38 : vector<8x32xf32> to vector<8x32xbf16>
      %c0_20 = arith.constant 0 : index
      %c0_21 = arith.constant 0 : index
      %40 = vector.load %arg11[%c0_20, %c0_21] : memref<8x64xf32, #tpu.memory_space<vmem>>, vector<8x64xf32>
      %c0_22 = arith.constant 0 : index
      %c0_23 = arith.constant 0 : index
      %c0_24 = arith.constant 0 : index
      %41 = vector.load %arg8[%c0_22, %c0_23, %c0_24] : memref<1x32x64xbf16, #tpu.memory_space<vmem>>, vector<1x32x64xbf16>
      %42 = vector.shape_cast %41 : vector<1x32x64xbf16> to vector<32x64xbf16>
      %cst_25 = arith.constant dense<0.000000e+00> : vector<8x64xf32>
      %43 = tpu.matmul %39, %42, %cst_25 {dimension_numbers = #tpu.dot_dimension_numbers<[1], [0], [0], [1], [0, 0, 1, 1], [], []>} : vector<8x32xbf16>, vector<32x64xbf16>, vector<8x64xf32> -> vector<8x64xf32>
      %44 = arith.addf %40, %43 : vector<8x64xf32>
      %c0_26 = arith.constant 0 : index
      %c0_27 = arith.constant 0 : index
      %45 = vector.load %arg11[%c0_26, %c0_27] : memref<8x64xf32, #tpu.memory_space<vmem>>, vector<8x64xf32>
      tpu.vector_store %arg11[%c0_26, %c0_27], %44 {strides = array<i32>} : memref<8x64xf32, #tpu.memory_space<vmem>>, vector<8x64xf32>,
    } else {
    }
    %c9_i32 = arith.constant 9 : i32
    %17 = arith.cmpi eq, %arg1, %c9_i32 : i32
    %c0_i32_7 = arith.constant 0 : i32
    %18 = arith.cmpi eq, %arg2, %c0_i32_7 : i32
    %19 = arith.andi %17, %18 : i1
    %20 = arith.extui %19 : i1 to i32
    %c0_i32_8 = arith.constant 0 : i32
    %21 = arith.cmpi ne, %20, %c0_i32_8 : i32
    scf.if %21 {
      %c0 = arith.constant 0 : index
      %c0_9 = arith.constant 0 : index
      %22 = vector.load %arg11[%c0, %c0_9] : memref<8x64xf32, #tpu.memory_space<vmem>>, vector<8x64xf32>
      %23 = arith.truncf %22 : vector<8x64xf32> to vector<8x64xbf16>
      %c0_10 = arith.constant 0 : index
      %c0_11 = arith.constant 0 : index
      %24 = vector.load %arg10[%c0_10, %c0_11] : memref<8x64xbf16, #tpu.memory_space<vmem>>, vector<8x64xbf16>
      tpu.vector_store %arg10[%c0_10, %c0_11], %23 {strides = array<i32>} : memref<8x64xbf16, #tpu.memory_space<vmem>>, vector<8x64xbf16>,
    } else {
    }
    return
  }
  func.func @transform_0(%arg0: i32, %arg1: i32, %arg2: i32, %arg3: memref<10xi32, #tpu.memory_space<smem>>, %arg4: memref<10xi32, #tpu.memory_space<smem>>) -> (i32, i32) {
    %c0_i32 = arith.constant 0 : i32
    %c0_i32_0 = arith.constant 0 : i32
    return %arg0, %c0_i32 : i32, i32
  }
  func.func @transform_1(%arg0: i32, %arg1: i32, %arg2: i32, %arg3: memref<10xi32, #tpu.memory_space<smem>>, %arg4: memref<10xi32, #tpu.memory_space<smem>>) -> (i32, i32, i32) {
    %c10_i32 = arith.constant 10 : i32
    %0 = arith.muli %arg0, %c10_i32 : i32
    %1 = arith.addi %0, %arg1 : i32
    %2 = arith.index_cast %1 : i32 to index
    %3 = memref.load %arg4[%2] : memref<10xi32, #tpu.memory_space<smem>>
    %4 = arith.muli %arg2, %3 : i32
    %c1_i32 = arith.constant 1 : i32
    %5 = arith.subi %c1_i32, %3 : i32
    %c0_i32 = arith.constant 0 : i32
    %6 = arith.muli %c0_i32, %5 : i32
    %7 = arith.addi %4, %6 : i32
    %8 = arith.index_cast %1 : i32 to index
    %9 = memref.load %arg3[%8] : memref<10xi32, #tpu.memory_space<smem>>
    %c0_i32_0 = arith.constant 0 : i32
    %c0_i32_1 = arith.constant 0 : i32
    return %9, %7, %c0_i32_0 : i32, i32, i32
  }
  func.func @transform_2(%arg0: i32, %arg1: i32, %arg2: i32, %arg3: memref<10xi32, #tpu.memory_space<smem>>, %arg4: memref<10xi32, #tpu.memory_space<smem>>) -> (i32, i32, i32) {
    %c10_i32 = arith.constant 10 : i32
    %0 = arith.muli %arg0, %c10_i32 : i32
    %1 = arith.addi %0, %arg1 : i32
    %2 = arith.index_cast %1 : i32 to index
    %3 = memref.load %arg4[%2] : memref<10xi32, #tpu.memory_space<smem>>
    %4 = arith.muli %arg2, %3 : i32
    %c1_i32 = arith.constant 1 : i32
    %5 = arith.subi %c1_i32, %3 : i32
    %c0_i32 = arith.constant 0 : i32
    %6 = arith.muli %c0_i32, %5 : i32
    %7 = arith.addi %4, %6 : i32
    %8 = arith.index_cast %1 : i32 to index
    %9 = memref.load %arg3[%8] : memref<10xi32, #tpu.memory_space<smem>>
    %c0_i32_0 = arith.constant 0 : i32
    %c0_i32_1 = arith.constant 0 : i32
    return %9, %7, %c0_i32_0 : i32, i32, i32
  }
  func.func @transform_3(%arg0: i32, %arg1: i32, %arg2: i32, %arg3: memref<10xi32, #tpu.memory_space<smem>>, %arg4: memref<10xi32, #tpu.memory_space<smem>>) -> (i32, i32, i32) {
    %c10_i32 = arith.constant 10 : i32
    %0 = arith.muli %arg0, %c10_i32 : i32
    %1 = arith.addi %0, %arg1 : i32
    %2 = arith.index_cast %1 : i32 to index
    %3 = memref.load %arg4[%2] : memref<10xi32, #tpu.memory_space<smem>>
    %4 = arith.muli %arg2, %3 : i32
    %c1_i32 = arith.constant 1 : i32
    %5 = arith.subi %c1_i32, %3 : i32
    %c0_i32 = arith.constant 0 : i32
    %6 = arith.muli %c0_i32, %5 : i32
    %7 = arith.addi %4, %6 : i32
    %8 = arith.index_cast %1 : i32 to index
    %9 = memref.load %arg3[%8] : memref<10xi32, #tpu.memory_space<smem>>
    %c0_i32_0 = arith.constant 0 : i32
    %c0_i32_1 = arith.constant 0 : i32
    return %9, %7, %c0_i32_0 : i32, i32, i32
  }
  func.func @transform_4(%arg0: i32, %arg1: i32, %arg2: i32, %arg3: memref<10xi32, #tpu.memory_space<smem>>, %arg4: memref<10xi32, #tpu.memory_space<smem>>) -> (i32, i32) {
    %c0_i32 = arith.constant 0 : i32
    %c0_i32_0 = arith.constant 0 : i32
    return %arg0, %c0_i32 : i32, i32
  }
  func.func @transform_5(%arg0: i32, %arg1: i32, %arg2: i32, %arg3: memref<10xi32, #tpu.memory_space<smem>>, %arg4: memref<10xi32, #tpu.memory_space<smem>>) -> (i32, i32) {
    %c0_i32 = arith.constant 0 : i32
    %c0_i32_0 = arith.constant 0 : i32
    return %arg0, %c0_i32 : i32, i32
  }
}

</mosaic_0001>

<bundles_post_ra>
// kernel: deepseek_moe_forward.2
= control target key start
LH: loop header
LB: loop body
LE: loop exit
PB: predicated region body
PF: predicated region fallthrough
CT: control target
= control target key end

     0   :  { %vm69_vm0 = vcmask 523264   ;;  %v190_v0 = vmov 0.0   ;;  %vm191_vm1 = vmmov 0   ;;  %s246_s1 = inlined_call_operand.vmem [shape: bf16[128,64], index: 1, kind: input, shape index: {}]   ;;  %s247_s0 = inlined_call_operand.vmem [shape: bf16[8,64], index: 0, kind: input, shape index: {}]   ;;  %s248_s2 = inlined_call_operand.vmem [shape: f32[8,128], index: 2, kind: output, shape index: {}]  }
   0x1   :  { %160 = vmatprep.subr.bf16.mxu0 %v190_v0  ;;  %v182_v1 = vld [vmem:[%s246_s1 + $0x38] sm:$0xff]   ;;  %176 = vmatprep.mubr.msk.bf16.mxu0 %vm191_vm1, %v190_v0  ;;  %v183_v3 = vld [vmem:[%s246_s1 + $0x30] sm:$0xff]   ;;  %v184_v5 = vld [vmem:[%s246_s1 + $0x28] sm:$0xff]  }
   0x2   :  { %v95_v2 = vsel %vm69_vm0, %v182_v1, 0  ;;  %v92_v4 = vsel %vm69_vm0, %v183_v3, 0  ;;  %v89_v6 = vsel %vm69_vm0, %v184_v5, 0  ;;  %v185_v7 = vld [vmem:[%s246_s1 + $0x20] sm:$0xff]   ;;  %v186_v9 = vld [vmem:[%s246_s1 + $0x18] sm:$0xff]   ;;  %v187_v11 = vld [vmem:[%s246_s1 + $0x10] sm:$0xff]  }
   0x3   :  { %161 = vmatpush3.bf16.xpose.msra.mxu0 %v95_v2  ;;  %v86_v8 = vsel %vm69_vm0, %v185_v7, 0  ;;  %v83_v10 = vsel %vm69_vm0, %v186_v9, 0  ;;  %v80_v12 = vsel %vm69_vm0, %v187_v11, 0  ;;  %v188_v13 = vld [vmem:[%s246_s1 + $0x8] sm:$0xff]   ;;  %v189_v15 = vld [vmem:[%s246_s1] sm:$0xff]  }
   0x4   :  { %162 = vmatprep.subr.bf16.mxu0 %v190_v0  ;;  %v77_v14 = vsel %vm69_vm0, %v188_v13, 0  ;;  %v74_v16 = vsel %vm69_vm0, %v189_v15, 0  ;;  %v12_v17 = vld [vmem:[%s247_s0] sm:$0xf] }
   0xb   :  { %163 = vmatpush3.bf16.xpose.msra.mxu0 %v92_v4 }
   0xc   :  { %164 = vmatprep.subr.bf16.mxu0 %v190_v0 }
  0x13   :  { %165 = vmatpush3.bf16.xpose.msra.mxu0 %v89_v6 }
  0x14   :  { %166 = vmatprep.subr.bf16.mxu0 %v190_v0 }
  0x1b   :  { %167 = vmatpush3.bf16.xpose.msra.mxu0 %v86_v8 }
  0x1c   :  { %168 = vmatprep.subr.bf16.mxu0 %v190_v0 }
  0x23   :  { %169 = vmatpush3.bf16.xpose.msra.mxu0 %v83_v10 }
  0x24   :  { %170 = vmatprep.subr.bf16.mxu0 %v190_v0 }
  0x2b   :  { %171 = vmatpush3.bf16.xpose.msra.mxu0 %v80_v12 }
  0x2c   :  { %172 = vmatprep.subr.bf16.mxu0 %v190_v0 }
  0x33   :  { %173 = vmatpush3.bf16.xpose.msra.mxu0 %v77_v14 }
  0x34   :  { %174 = vmatprep.subr.bf16.mxu0 %v190_v0 }
  0x3b   :  { %175 = vmatpush3.bf16.xpose.msra.mxu0 %v74_v16 }
  0x42   :  { %177 = vmatmul.mubr.msk.bf16.vlgmr.msra.gmra.mxu0 %vm69_vm0, %v12_v17 }
 0x102   :  { %v131_v18 = vpop.f32.mrf.mxu0 }
 0x103   :  { %137 = vst [vmem:[%s248_s2] sm:$0xff] %v131_v18 }
 0x104   :  { %v178_v19 = vpop.f32.mrf.mxu0 }
 0x106   :  { %v134_v20 = vpop.f32.mrf.mxu0 }
 0x108   :  { %v179_v21 = vpop.f32.mrf.mxu0 }

// kernel: deepseek_moe_forward.3
= control target key start
LH: loop header
LB: loop body
LE: loop exit
PB: predicated region body
PF: predicated region fallthrough
CT: control target
= control target key end

     0   :  { %s1148_s0 = inlined_call_operand.vmem [shape: s32[10], index: 0, kind: input, shape index: {}]   ;;  %s1149_s2 = inlined_call_operand.vmem [shape: bf16[8,64], index: 2, kind: input, shape index: {}]   ;;  %s1150_s3 = inlined_call_operand.vmem [shape: bf16[10,32,64], index: 3, kind: input, shape index: {}]   ;;  %s1151_s4 = inlined_call_operand.vmem [shape: bf16[10,32,64], index: 4, kind: input, shape index: {}]   ;;  %s1152_s5 = inlined_call_operand.vmem [shape: bf16[10,32,64], index: 5, kind: input, shape index: {}]   ;;  %s1153_s6 = inlined_call_operand.vmem [shape: f32[8,128], index: 6, kind: input, shape index: {}]   ;;  %s1154_s7 = inlined_call_operand.vmem [shape: bf16[8,64], index: 7, kind: output, shape index: {}]   ;;  %s1155_s1 = inlined_call_operand.vmem [shape: s32[10], index: 1, kind: input, shape index: {}]  }
   0x1   :  { %s12_s26 = sshll.u32 %s1148_s0, 4  ;;  %s16_s29 = sshll.u32 %s1155_s1, 4  ;;  %s13_s26 = int_to_ptr.vmem [resolvable:$true] %s12_s26  ;;  %s17_s29 = int_to_ptr.vmem [resolvable:$true] %s16_s29 }
   0x2   :  { %s968_s30 = scalar_lea.vmem %s13_s26, 16  ;;  %p973_p1 = scmp.lt.s32.totalorder %s13_s26, %s13_s26 }
   0x3   :  { %p969_p0 = scmp.ne.s32.totalorder %s13_s26, %s968_s30  ;;  %p974_p2 = scmp.lt.s32.totalorder %s968_s30, %s968_s30 }
   0x5   :  { %p975_p3 = por %p974_p2, %p973_p1 }
   0x7   :  { %p976_p4 = pnand %p975_p3, %p969_p0 }
   0x9   :  { %979 = shalt.err (!%p976_p4)  }
   0xa   :  { %s1018_s8 = smov [#allocation5]   ;;  %s980_s9 = scalar_lea.vmem %s17_s29, 16 }
   0xb   :  { %15 = dma.vmem_to_smem %s13_s26, 16, %s1018_s8, [#allocation4] }
   0xc   :  { %p981_p5 = scmp.ne.s32.totalorder %s17_s29, %s980_s9  ;;  %p985_p6 = scmp.lt.s32.totalorder %s17_s29, %s17_s29 }
   0xd   :  { %p986_p7 = scmp.lt.s32.totalorder %s980_s9, %s980_s9 }
   0xf   :  { %p987_p8 = por %p986_p7, %p985_p6 }
  0x11   :  { %p988_p9 = pnand %p987_p8, %p981_p5 }
  0x13   :  { %991 = shalt.err (!%p988_p9)  }
  0x14   :  { %s1019_s0 = smov [#allocation6]  }
  0x15   :  { %19 = dma.vmem_to_smem %s17_s29, 16, %s1019_s0, [#allocation4] }
  0x16   :  { %1004 = dma.done.wait [#allocation4], 32 }
  0x17   :  { %1005 = vsyncadd [#allocation4], 4294967264 }
  0x18   :  { %21 = sfence }
  0x19   :  { %s1070_s1 = smov 0   ;;  %s1072_s10 = smov 0  }
  0x1a   :  { %s1074_s11 = smov 0  }
  0x1b LB: > { %s42_s12 = sadd.s32 1, %s1012_s10  ;;  %p864_p10 = scmp.ge.s32.totalorder %s1016_s11, 1  ;;  %s1016_s11 = sphi %s1074_s11, %s27_s11   ;;  %s1012_s10 = sphi %s1072_s10, %s1157_s10   ;;  %s1008_s1 = sphi %s1070_s1, %s1156_s1  }
  0x1c   : > { %p44_p11 = scmp.ge.s32.totalorder %s42_s12, 10  ;;  %p337_p12 = scmp.lt.s32.totalorder %s1016_s11, 11 }
  0x1e   : > { %s1159_s12 = smov (%p44_p11, %s42_s12), 0  ;;  %p338_p13 = pnand %p864_p10, %p337_p12 }
  0x1f   : > { %s417_s13 = sld [smem:[#allocation5 + %s1008_s1]] (!%p338_p13)  ;;  %p482_p0 = scmp.eq.s32.totalorder (!%p338_p13), %s1008_s1, 0 }
  0x20   : > { %341 = sbr.rel (%p338_p13) target bundleno = 666 (0x29a), region = 40  ;;  %s437_s14 = sld [smem:[#allocation5 + %s1008_s1]] (!%p338_p13) }
  0x21   : > { %s457_s15 = sld [smem:[#allocation5 + %s1008_s1]] (!%p338_p13) }
  0x25   : > { %p419_p1 = scmp.lt.s32.totalorder %s417_s13, 9  ;;  %vm488_vm0 = vcmask (%p482_p0), 523264   ;;  %v1020_v0 = vmov (%p482_p0), 0.0  }
  0x26   : > { %p439_p2 = scmp.lt.s32.totalorder %s437_s14, 9  ;;  %489 = vst.msk [vmem:[#allocation2] sm:$0xff] (%p482_p0), %vm488_vm0, %v1020_v0 }
  0x27   : > { %s1161_s13 = smov (!%p419_p1, %s417_s13), 9  ;;  %p459_p3 = scmp.lt.s32.totalorder %s457_s15, 9 }
  0x28   : > { %s1163_s14 = smov (!%p439_p2, %s437_s14), 9  ;;  %s888_s16 = sshll.u32 %s1161_s13, 4 }
  0x29   : > { %s1097_s19 = scalar_lea.vmem %s1150_s3, %s888_s16  ;;  %s889_s20 = sshll.u32 %s1163_s14, 4 }
  0x2a   : > { %s1102_s23 = scalar_lea.vmem %s1151_s4, %s889_s20  ;;  %s1165_s15 = smov (!%p459_p3, %s457_s15), 9 }
  0x2b   : > { %s890_s24 = sshll.u32 %s1165_s15, 4  ;;  %487 = sbr.rel (!%p482_p0) target bundleno = 48 (0x30), region = 44 }
  0x2c   : > { %s1107_s27 = scalar_lea.vmem %s1152_s5, %s890_s24 }
  0x30 PF: > { %s492_s28 = sld [smem:[#allocation6 + %s1008_s1]] }
  0x36   : > { %p493_p4 = scmp.ne.s32.totalorder %s492_s28, 0 }
  0x37   : > { %s498_s29 = sld [smem:[#allocation5 + %s1008_s1]] (%p493_p4)  ;;  %v499_v1 = vlaneseq (%p493_p4)  ;;  %v503_v3 = vld [vmem:[%s1153_s6] sm:$0xff] (%p493_p4)  ;;  %vm507_vm2 = vcmask (%p493_p4), 7168  }
  0x38   : > { %497 = sbr.rel (!%p493_p4) target bundleno = 203 (0xcb), region = 48 }
  0x39   : > { %v500_v2 = vand.u32 (%p493_p4), 127, %v499_v1 }
  0x3d   : > { %v501_v4 = vstv %s498_s29 }
  0x3e   : > { %vm502_vm1 = vcmp.eq.s32.totalorder %v500_v2, %v501_v4 }
  0x3f   : > { %v504_v5 = vsel %vm502_vm1, %v503_v3, 0.0 }
  0x40   : > { %505 = vadd.xlane.f32.xlu0 %v504_v5 }
  0xc9   : > { %v506_v6 = vpop.xlane.xlu0 %505 }
  0xca   : > { %508 = vst.msk [vmem:[#allocation3] sm:$0xff] %vm507_vm2, %v506_v6 }
  0xcb PF: > { %p873_p5 = scmp.eq.s32.totalorder %s492_s28, 0 }
  0xcd   : > { %511 = sbr.rel (%p873_p5) target bundleno = 659 (0x293), region = 52 }
  0xd2   : > { %v958_v7 = vld [vmem:[%s1097_s19 + $0x8] sm:$0xff]   ;;  %v1021_v8 = vmov 0.0   ;;  %vm527_vm3 = vcmask 523264   ;;  %vm1022_vm4 = vmmov 0   ;;  %v959_v11 = vld [vmem:[%s1097_s19] sm:$0xff]   ;;  %v1023_v14 = vmov 0  }
  0xd3   : > { %903 = vmatprep.subr.bf16.mxu0 %v1021_v8  ;;  %911 = vmatprep.subr.bf16.mxu1 %v1021_v8  ;;  %v535_v9 = vsel %vm527_vm3, %v958_v7, 0  ;;  %v960_v10 = vld [vmem:[%s1102_s23 + $0x8] sm:$0xff]   ;;  %v961_v15 = vld [vmem:[%s1102_s23] sm:$0xff]   ;;  %v532_v16 = vsel %vm527_vm3, %v959_v11, 0  ;;  %vm670_vm5 = vcmask 261120  }
  0xd4   : > { %904 = vmatpush3.bf16.xpose.msra.mxu0 %v535_v9  ;;  %907 = vmatprep.mubr.msk.bf16.mxu0 %vm1022_vm4, %v1021_v8  ;;  %v637_v12 = vld [vmem:[#allocation3] sm:$0xff]  ;;  %v595_v13 = vsel %vm527_vm3, %v960_v10, 0  ;;  %v592_v17 = vsel %vm527_vm3, %v961_v15, 0  ;;  %v512_v18 = vld [vmem:[%s1149_s2] sm:$0xf] }
  0xd5   : > { %905 = vmatprep.subr.bf16.mxu0 %v1021_v8  ;;  %915 = vmatprep.mubr.msk.bf16.mxu1 %vm1022_vm4, %v1021_v8  ;;  %v962_v19 = vld [vmem:[%s1107_s27 + $0x8] sm:$0xff]   ;;  %v963_v20 = vld [vmem:[%s1107_s27] sm:$0xff]  }
  0xd6   : > { %957 = vset.pattern.permute.xlu0 %v1023_v14  ;;  %912 = vmatpush3.bf16.xpose.msra.mxu1 %v595_v13  ;;  %v653_v38 = vld [vmem:[#allocation2] sm:$0xff] }
  0xd7   : > { %648 = vperm.xlu0 %957, %v637_v12   ;;  %913 = vmatprep.subr.bf16.mxu1 %v1021_v8 }
  0xdc   : > { %906 = vmatpush3.bf16.xpose.msra.mxu0 %v532_v16 }
  0xdd   : > { %919 = vmatprep.subr.bf16.mxu0 %v1021_v8 }
  0xde   : > { %914 = vmatpush3.bf16.xpose.msra.mxu1 %v592_v17 }
  0xe3   : > { %908 = vmatmul.mubr.msk.bf16.vlgmr.msra.gmra.mxu0 %vm527_vm3, %v512_v18 }
  0xe4   : > { %923 = vmatprep.mubr.msk.bf16.mxu0 %vm1022_vm4, %v1021_v8  ;;  %920 = vmatpush3.bf16.msra.mxu0 %v962_v19 }
  0xe5   : > { %916 = vmatmul.mubr.msk.bf16.vlgmr.msra.gmra.mxu1 %vm527_vm3, %v512_v18  ;;  %921 = vmatprep.subr.bf16.mxu0 %v1021_v8 }
  0xe8   : > { %922 = vmatpush3.bf16.msra.mxu0 %v963_v20 }
 0x152   : > { %v649_v34 = vpop.permute.xlu0 %648 }
 0x1a3   : > { %v571_v21 = vpop.f32.mrf.mxu0 }
 0x1a4   : > { %v880_v22 = vmul.f32 -1.442695, %v571_v21 }
 0x1a5   : > { %v909_v23 = vpop.f32.mrf.mxu0  ;;  %v631_v24 = vpop.f32.mrf.mxu1 }
 0x1a6   : > { %964 = vpow2.f32 %v880_v22 }
 0x1a7   : > { %v574_v25 = vpop.f32.mrf.mxu0  ;;  %v917_v26 = vpop.f32.mrf.mxu1 }
 0x1a9   : > { %v910_v27 = vpop.f32.mrf.mxu0  ;;  %v634_v28 = vpop.f32.mrf.mxu1 }
 0x1ab   : > { %v918_v29 = vpop.f32.mrf.mxu1 }
 0x1b3   : > { %v965_v30 = vpop.eup %964 }
 0x1b4   : > { %v641_v31 = vadd.f32 1.0, %v965_v30 }
 0x1b6   : > { %966 = vrcp.f32 %v641_v31 }
 0x1c3   : > { %v967_v32 = vpop.eup %966 }
 0x1c4   : > { %v644_v33 = vmul.f32 %v967_v32, %v571_v21 }
 0x1c6   : > { %v645_v35 = vmul.f32 %v644_v33, %v631_v24 }
 0x1c8   : > { %v651_v36 = vmul.f32 %v649_v34, %v645_v35 }
 0x1ca   : > { %v652_v37 = vpack.c.bf16 %v651_v36, %v651_v36 }
 0x1cc   : > { %924 = vmatmul.mubr.msk.bf16.vlgmr.msra.gmra.mxu0 %vm670_vm5, %v652_v37 }
 0x28c   : > { %v708_v39 = vpop.f32.mrf.mxu0 }
 0x28d   : > { %v714_v40 = vadd.f32 %v708_v39, %v653_v38 }
 0x28e   : > { %v925_v41 = vpop.f32.mrf.mxu0 }
 0x28f   : > { %715 = vst.msk [vmem:[#allocation2] sm:$0xff] %vm527_vm3, %v714_v40 }
 0x290   : > { %v711_v42 = vpop.f32.mrf.mxu0 }
 0x292   : > { %v926_v43 = vpop.f32.mrf.mxu0 }
 0x293 PF: > { %p716_p6 = scmp.eq.s32.totalorder %s1008_s1, 9 }
 0x294   : > { %vm723_vm6 = vcmask (%p716_p6), 519168  }
 0x295   : > { %720 = sbr.rel (!%p716_p6) target bundleno = 666 (0x29a), region = 56 }
 0x296   : > { %v721_v44 = vld [vmem:[#allocation2] sm:$0xff] (%p716_p6) }
 0x297   : > { %v722_v45 = vpack.c.bf16 (%p716_p6), %v721_v44, %v721_v44 }
 0x299   : > { %724 = vst.msk [vmem:[%s1154_s7] sm:$0xf] (%p716_p6), %vm723_vm6, %v722_v45 }
 0x29a PF: > { %s27_s11 = sadd.s32 1, %s1016_s11   ;;  %s1156_s1 = smov %s1012_s10 }
 0x29b   : > { %p24_p7 = scmp.ge.s32.totalorder %s27_s11, 12   ;;  %s1157_s10 = smov %s1159_s12 }
 0x29d   :  { %26 = sbr.rel (!%p24_p7) target bundleno = 27 (0x1b), region = 98 }

</bundles_post_ra>
